<compile_context>
chip_gen: v7x
topology: tpu7x:2x2x1
jax: 0.10.0
libtpu: 0.0.40
codegen_flags: <defaults>
</compile_context>

<pallas_src>
import functools

import jax
import jax.numpy as jnp
from jax.experimental import pallas as pl
from jax.experimental.pallas import tpu as pltpu


def _round_up(v, m):
    return (v + m - 1) // m * m


def _ratio_kernel(x_ref, w_ref, b_ref, *out_refs, training, max_ratio, c_pad):
    eps = 1e-08

    # Single fused matmul for both heads: w_ref is [D, 2*c_pad] bf16.
    x = x_ref[...].astype(jnp.bfloat16)
    y = jnp.dot(x, w_ref[...], preferred_element_type=jnp.float32) + b_ref[...]

    i = y[:, :c_pad]          # inlier head (lane-aligned slice)
    o = y[:, c_pad:]          # outlier head
    if training:
        i = jnp.clip(i, -max_ratio, max_ratio)
        o = jnp.clip(o, -max_ratio, max_ratio)

    # f32 elementwise epilogue; approx reciprocal runs on the EUP slot.
    sig_i = jax.nn.sigmoid(i)
    sig_o = jax.nn.sigmoid(o)
    logits = sig_i * pl.reciprocal(sig_o + eps, approx=True)

    out_refs[0][...] = logits
    if not training:
        out_refs[1][...] = i
        out_refs[2][...] = o


def ratio_layer(x, w_in_t, b_in, w_out_t, b_out, *, training=False,
                max_ratio=50.0, block_rows=None):
    """Pallas implementation of RatioLayer.forward.

    Args:
      x:       [B, in_features] float32
      w_in_t:  [in_features, num_classes] float32  (inlier.weight transposed)
      b_in:    [1, num_classes] (or [num_classes]) float32
      w_out_t: [in_features, num_classes] float32  (outlier.weight transposed)
      b_out:   [1, num_classes] (or [num_classes]) float32
      training: Python bool (static). True -> clamped logits only.
                False -> (logits, i, o) like eval mode.
      block_rows: optional batch tile override (multiple of 8).
    """
    B, D = x.shape
    C = w_in_t.shape[1]
    c_pad = _round_up(C, 128)          # lane-dense class axis per head
    c2 = 2 * c_pad                      # [inlier | outlier]

    # Pack + pad both heads into a single bf16 weight slab and f32 bias slab.
    w_packed = jnp.zeros((D, c2), jnp.bfloat16)
    w_packed = w_packed.at[:, :C].set(w_in_t.astype(jnp.bfloat16))
    w_packed = w_packed.at[:, c_pad:c_pad + C].set(w_out_t.astype(jnp.bfloat16))
    b_packed = jnp.zeros((1, c2), jnp.float32)
    b_packed = b_packed.at[:, :C].set(jnp.reshape(b_in, (1, C)).astype(jnp.float32))
    b_packed = b_packed.at[:, c_pad:c_pad + C].set(
        jnp.reshape(b_out, (1, C)).astype(jnp.float32))

    # Batch tiling: multiple of 8 rows, capped at 512 (fits v7x's 64 MiB VMEM
    # with double buffering at any realistic in_features).
    if block_rows is None:
        block_rows = min(_round_up(B, 8), 512)
    tb = int(block_rows)
    b_pad = _round_up(B, tb)
    if b_pad != B:
        x = jnp.pad(x, ((0, b_pad - B), (0, 0)))
    grid = (b_pad // tb,)

    n_out = 1 if training else 3
    out_shapes = tuple(jax.ShapeDtypeStruct((b_pad, c_pad), jnp.float32)
                       for _ in range(n_out))
    out_specs = tuple(pl.BlockSpec((tb, c_pad), lambda b: (b, 0))
                      for _ in range(n_out))

    kernel = functools.partial(_ratio_kernel, training=training,
                               max_ratio=float(max_ratio), c_pad=c_pad)

    # Explicit VMEM budget: double-buffered x + outputs, weights/bias, y temp.
    vmem_est = (2 * (tb * D * 4 + n_out * tb * c_pad * 4 + tb * c2 * 4)
                + 2 * (D * c2 * 2 + c2 * 4))
    vmem_limit = int(min(vmem_est * 2 + (16 << 20), 64 << 20))

    outs = pl.pallas_call(
        kernel,
        grid=grid,
        out_shape=out_shapes,
        in_specs=[
            pl.BlockSpec((tb, D), lambda b: (b, 0)),     # x: tiled over batch
            pl.BlockSpec((D, c2), lambda b: (0, 0)),     # fused weights (resident)
            pl.BlockSpec((1, c2), lambda b: (0, 0)),     # fused bias (resident)
        ],
        out_specs=out_specs,
        compiler_params=pltpu.CompilerParams(
            dimension_semantics=("parallel",),
            vmem_limit_bytes=vmem_limit),
    )(x, w_packed, b_packed)

    outs = tuple(o[:B, :C] for o in outs)   # strip batch + lane padding
    if training:
        return outs[0]
    return outs


def init_ratio_layer_params(key, in_features, num_classes):
    """Kaiming-normal (relu, fan_in) init matching RatioLayer.init_weights."""
    k_in, k_out = jax.random.split(key)
    std = (2.0 / in_features) ** 0.5
    # PyTorch weight is [num_classes, in_features]; store the transpose directly.
    w_in_t = jax.random.normal(k_in, (in_features, num_classes), jnp.float32) * std
    w_out_t = jax.random.normal(k_out, (in_features, num_classes), jnp.float32) * std
    b_in = jnp.zeros((1, num_classes), jnp.float32)
    b_out = jnp.zeros((1, num_classes), jnp.float32)
    return w_in_t, b_in, w_out_t, b_out


if __name__ == "__main__":
    B, in_features, num_classes = 8, 32, 10
    eps = 1e-08

    key = jax.random.PRNGKey(0)
    k_x, k_params = jax.random.split(key)

    x = jax.random.normal(k_x, (B, in_features), jnp.float32)
    w_in_t, b_in, w_out_t, b_out = init_ratio_layer_params(
        k_params, in_features, num_classes)

    # Eval-mode forward: (logits, i, o)
    logits, i, o = ratio_layer(x, w_in_t, b_in, w_out_t, b_out, training=False)
    jax.block_until_ready((logits, i, o))

    # Reference (f32) — kernel uses bf16 matmul operands + approx reciprocal,
    # so tolerances are slightly loosened.
    i_ref = x @ w_in_t + b_in
    o_ref = x @ w_out_t + b_out
    logits_ref = jax.nn.sigmoid(i_ref) / (jax.nn.sigmoid(o_ref) + eps)
    assert i.shape == (B, num_classes) and logits.shape == (B, num_classes)
    assert jnp.allclose(i, i_ref, atol=3e-2), "i mismatch"
    assert jnp.allclose(o, o_ref, atol=3e-2), "o mismatch"
    assert jnp.allclose(logits, logits_ref, atol=5e-2, rtol=1e-2), "logits mismatch"

    # Training-mode forward: clamped logits only (single HBM output).
    logits_tr = ratio_layer(x, w_in_t, b_in, w_out_t, b_out, training=True)
    jax.block_until_ready(logits_tr)
    i_c = jnp.clip(i_ref, -50.0, 50.0)
    o_c = jnp.clip(o_ref, -50.0, 50.0)
    logits_tr_ref = jax.nn.sigmoid(i_c) / (jax.nn.sigmoid(o_c) + eps)
    assert logits_tr.shape == (B, num_classes)
    assert jnp.allclose(logits_tr, logits_tr_ref, atol=5e-2, rtol=1e-2), \
        "training logits mismatch"

    # Non-multiple batch + small tile to exercise the batch grid and padding.
    x2 = jax.random.normal(jax.random.PRNGKey(1), (20, in_features), jnp.float32)
    lg2, i2, o2 = ratio_layer(x2, w_in_t, b_in, w_out_t, b_out,
                              training=False, block_rows=8)
    jax.block_until_ready((lg2, i2, o2))
    i2_ref = x2 @ w_in_t + b_in
    assert lg2.shape == (20, num_classes)
    assert jnp.allclose(i2, i2_ref, atol=3e-2), "gridded i mismatch"

    print("KERNEL_OK")
</pallas_src>

<mosaic_0001>
module attributes {stable_mosaic.version = 11 : i64} {
  func.func @_ratio_kernel(%arg0: i32, %arg1: memref<8x32xf32, #tpu.memory_space<vmem>>, %arg2: memref<32x256xbf16, #tpu.memory_space<vmem>>, %arg3: memref<1x256xf32, #tpu.memory_space<vmem>>, %arg4: memref<8x128xf32, #tpu.memory_space<vmem>>, %arg5: memref<8x128xf32, #tpu.memory_space<vmem>>, %arg6: memref<8x128xf32, #tpu.memory_space<vmem>>) attributes {dimension_semantics = [#tpu.dimension_semantics<parallel>], iteration_bounds = array<i64: 1>, scalar_prefetch = 0 : i64, scratch_operands = 0 : i64, tpu.core_type = #tpu.core_type<tc>, window_params = [{transform_indices = @transform_0, window_bounds = array<i64: 8, 32>}, {pipeline_mode = #tpu.pipeline_mode<synchronous>, transform_indices = @transform_1, window_bounds = array<i64: 32, 256>}, {pipeline_mode = #tpu.pipeline_mode<synchronous>, transform_indices = @transform_2, window_bounds = array<i64: 1, 256>}, {transform_indices = @transform_3, window_bounds = array<i64: 8, 128>}, {transform_indices = @transform_4, window_bounds = array<i64: 8, 128>}, {transform_indices = @transform_5, window_bounds = array<i64: 8, 128>}]} {
    %c0 = arith.constant 0 : index
    %c0_0 = arith.constant 0 : index
    %0 = vector.load %arg1[%c0, %c0_0] : memref<8x32xf32, #tpu.memory_space<vmem>>, vector<8x32xf32>
    %1 = arith.truncf %0 : vector<8x32xf32> to vector<8x32xbf16>
    %c0_1 = arith.constant 0 : index
    %c0_2 = arith.constant 0 : index
    %2 = vector.load %arg2[%c0_1, %c0_2] : memref<32x256xbf16, #tpu.memory_space<vmem>>, vector<32x256xbf16>
    %cst = arith.constant dense<0.000000e+00> : vector<8x256xf32>
    %3 = tpu.matmul %1, %2, %cst {dimension_numbers = #tpu.dot_dimension_numbers<[1], [0], [0], [1], [0, 0, 1, 1], [], []>} : vector<8x32xbf16>, vector<32x256xbf16>, vector<8x256xf32> -> vector<8x256xf32>
    %c0_3 = arith.constant 0 : index
    %c0_4 = arith.constant 0 : index
    %4 = vector.load %arg3[%c0_3, %c0_4] : memref<1x256xf32, #tpu.memory_space<vmem>>, vector<1x256xf32>
    %5 = vector.broadcast %4 : vector<1x256xf32> to vector<8x256xf32>
    %6 = arith.addf %3, %5 : vector<8x256xf32>
    %7 = vector.extract_strided_slice %6 {offsets = [0, 0], sizes = [8, 128], strides = [1, 1]} : vector<8x256xf32> to vector<8x128xf32>
    %8 = vector.extract_strided_slice %6 {offsets = [0, 128], sizes = [8, 128], strides = [1, 1]} : vector<8x256xf32> to vector<8x128xf32>
    %9 = arith.negf %7 : vector<8x128xf32>
    %10 = math.exp %9 : vector<8x128xf32>
    %cst_5 = arith.constant 1.000000e+00 : f32
    %11 = vector.broadcast %cst_5 : f32 to vector<8x128xf32>
    %12 = arith.addf %11, %10 : vector<8x128xf32>
    %13 = arith.divf %11, %12 : vector<8x128xf32>
    %14 = arith.negf %8 : vector<8x128xf32>
    %15 = math.exp %14 : vector<8x128xf32>
    %cst_6 = arith.constant 1.000000e+00 : f32
    %16 = vector.broadcast %cst_6 : f32 to vector<8x128xf32>
    %17 = arith.addf %16, %15 : vector<8x128xf32>
    %18 = arith.divf %16, %17 : vector<8x128xf32>
    %cst_7 = arith.constant 9.99999993E-9 : f32
    %19 = vector.broadcast %cst_7 : f32 to vector<8x128xf32>
    %20 = arith.addf %18, %19 : vector<8x128xf32>
    %21 = tpu.reciprocal %20 {approx = true} : vector<8x128xf32> -> vector<8x128xf32>
    %22 = arith.mulf %13, %21 : vector<8x128xf32>
    %c0_8 = arith.constant 0 : index
    %c0_9 = arith.constant 0 : index
    %23 = vector.load %arg4[%c0_8, %c0_9] : memref<8x128xf32, #tpu.memory_space<vmem>>, vector<8x128xf32>
    tpu.vector_store %arg4[%c0_8, %c0_9], %22 {strides = array<i32>} : memref<8x128xf32, #tpu.memory_space<vmem>>, vector<8x128xf32>,
    %c0_10 = arith.constant 0 : index
    %c0_11 = arith.constant 0 : index
    %24 = vector.load %arg5[%c0_10, %c0_11] : memref<8x128xf32, #tpu.memory_space<vmem>>, vector<8x128xf32>
    tpu.vector_store %arg5[%c0_10, %c0_11], %7 {strides = array<i32>} : memref<8x128xf32, #tpu.memory_space<vmem>>, vector<8x128xf32>,
    %c0_12 = arith.constant 0 : index
    %c0_13 = arith.constant 0 : index
    %25 = vector.load %arg6[%c0_12, %c0_13] : memref<8x128xf32, #tpu.memory_space<vmem>>, vector<8x128xf32>
    tpu.vector_store %arg6[%c0_12, %c0_13], %8 {strides = array<i32>} : memref<8x128xf32, #tpu.memory_space<vmem>>, vector<8x128xf32>,
    return
  }
  func.func @transform_0(%arg0: i32) -> (i32, i32) {
    %c0_i32 = arith.constant 0 : i32
    %c0_i32_0 = arith.constant 0 : i32
    return %arg0, %c0_i32 : i32, i32
  }
  func.func @transform_1(%arg0: i32) -> (i32, i32) {
    %c0_i32 = arith.constant 0 : i32
    %c0_i32_0 = arith.constant 0 : i32
    %c0_i32_1 = arith.constant 0 : i32
    return %c0_i32, %c0_i32_0 : i32, i32
  }
  func.func @transform_2(%arg0: i32) -> (i32, i32) {
    %c0_i32 = arith.constant 0 : i32
    %c0_i32_0 = arith.constant 0 : i32
    %c0_i32_1 = arith.constant 0 : i32
    return %c0_i32, %c0_i32_0 : i32, i32
  }
  func.func @transform_3(%arg0: i32) -> (i32, i32) {
    %c0_i32 = arith.constant 0 : i32
    %c0_i32_0 = arith.constant 0 : i32
    return %arg0, %c0_i32 : i32, i32
  }
  func.func @transform_4(%arg0: i32) -> (i32, i32) {
    %c0_i32 = arith.constant 0 : i32
    %c0_i32_0 = arith.constant 0 : i32
    return %arg0, %c0_i32 : i32, i32
  }
  func.func @transform_5(%arg0: i32) -> (i32, i32) {
    %c0_i32 = arith.constant 0 : i32
    %c0_i32_0 = arith.constant 0 : i32
    return %arg0, %c0_i32 : i32, i32
  }
}

</mosaic_0001>

<bundles_post_ra>
// kernel: tpu_custom_call.1
= control target key start
LH: loop header
LB: loop body
LE: loop exit
PB: predicated region body
PF: predicated region fallthrough
CT: control target
= control target key end

     0   :  { %11 = vsyncpa [#allocation3], 0  ;;  %s454_s0 = inlined_call_operand.hbm [shape: f32[8,32], index: 0, kind: input, shape index: {}]   ;;  %s455_s1 = inlined_call_operand.hbm [shape: bf16[32,256], index: 1, kind: input, shape index: {}]   ;;  %s456_s2 = inlined_call_operand.vmem [shape: f32[1,256], index: 2, kind: input, shape index: {}]   ;;  %s457_s3 = inlined_call_operand.hbm [shape: f32[8,128], index: 3, kind: output, shape index: {0}]   ;;  %s458_s4 = inlined_call_operand.hbm [shape: f32[8,128], index: 4, kind: output, shape index: {1}]   ;;  %s459_s5 = inlined_call_operand.hbm [shape: f32[8,128], index: 5, kind: output, shape index: {2}]  }
   0x1   :  { %12 = vsyncpa [#allocation6], 0 }
   0x2   :  { %13 = vsyncpa [#allocation4], 0 }
   0x3   :  { %14 = vsyncpa [#allocation9], 0  ;;  %s339_s18 = smov [#allocation2]   ;;  %s340_s20 = smov [#allocation5]  }
   0x4   :  { %s21_s19 = sshll.u32 %s339_s18, 4  ;;  %s30_s21 = sshll.u32 %s340_s20, 4  ;;  %s22_s19 = int_to_ptr.vmem [resolvable:$true] %s21_s19  ;;  %s377_s21 = int_to_ptr.vmem [resolvable:$true] %s30_s21 }
   0x5   :  { %s221_s24 = scalar_lea.hbm %s454_s0, 128 }
   0x6   :  { %p222_p0 = scmp.ne.s32.totalorder %s454_s0, %s221_s24  ;;  %p225_p1 = scmp.lt.u32.totalorder %s221_s24, %s454_s0 }
   0x8   :  { %p227_p2 = pnand %p225_p1, %p222_p0 }
   0xa   :  { %230 = shalt.err (!%p227_p2)
}
   0xb   :  { %s231_s29 = scalar_lea.vmem %s22_s19, 128  ;;  %p236_p4 = scmp.lt.s32.totalorder %s22_s19, %s22_s19 }
   0xc   :  { %p232_p3 = scmp.ne.s32.totalorder %s22_s19, %s231_s29  ;;  %p237_p5 = scmp.lt.s32.totalorder %s231_s29, %s231_s29 }
   0xe   :  { %p238_p6 = por %p237_p5, %p236_p4 }
  0x10   :  { %p239_p7 = pnand %p238_p6, %p232_p3 }
  0x12   :  { %242 = shalt.err (!%p239_p7)
}
  0x13   :  { %24 = dma.hbm_to_vmem [thread:$0]  %s454_s0, 128, %s22_s19, [#allocation3]  }
  0x14   :  { %s243_s9 = scalar_lea.hbm %s455_s1, 512 }
  0x15   :  { %p244_p8 = scmp.ne.s32.totalorder %s455_s1, %s243_s9  ;;  %p247_p9 = scmp.lt.u32.totalorder %s243_s9, %s455_s1 }
  0x17   :  { %p249_p10 = pnand %p247_p9, %p244_p8 }
  0x19   :  { %252 = shalt.err (!%p249_p10)
}
  0x1a   :  { %s253_s14 = scalar_lea.vmem %s377_s21, 512  ;;  %p258_p12 = scmp.lt.s32.totalorder %s377_s21, %s377_s21 }
  0x1b   :  { %p254_p11 = scmp.ne.s32.totalorder %s377_s21, %s253_s14  ;;  %p259_p13 = scmp.lt.s32.totalorder %s253_s14, %s253_s14 }
  0x1d   :  { %p260_p0 = por %p259_p13, %p258_p12 }
  0x1f   :  { %p261_p1 = pnand %p260_p0, %p254_p11 }
  0x21   :  { %264 = shalt.err (!%p261_p1)
}
  0x22   :  { %s341_s0 = smov 128   ;;  %s342_s15 = smov 8  }
  0x23   :  { %36 = dma.hbm_to_vmem [thread:$0]  %s455_s1, 512, %s377_s21, [#allocation6], %s341_s0, %s341_s0, %s342_s15  }
  0x24   :  { %331 = dma.done.wait [#allocation3], 128  }
  0x25   :  { %332 = vsyncadd [#allocation3], 4294967168 }
  0x26   :  { %333 = dma.done.wait [#allocation6], 512  }
  0x27   :  { %334 = vsyncadd [#allocation6], 4294966784  ;;  %v343_v0 = vmov 0   ;;  %v205_v1 = vld [vmem:[#allocation5 + $0x4] ss:$8 sps:$4 sm:$0xff]   ;;  %v46_v5 = vld [vmem:[#allocation2] sm:$0xff]  ;;  %v54_v7 = vlaneseq }
  0x28   :  { %120 = vmatprep.mubr.bf16.mxu0 %v343_v0  ;;  %v207_v2 = vld [vmem:[#allocation5] ss:$8 sps:$4 sm:$0xff]   ;;  %88 = vmatprep.subr.bf16.mxu0 %v205_v1  ;;  %v208_v3 = vld [vmem:[#allocation5 + $0x14] ss:$8 sps:$4 sm:$0xff]   ;;  %v210_v4 = vld [vmem:[#allocation5 + $0x10] ss:$8 sps:$4 sm:$0xff]   ;;  %v47_v6 = vpack.c.bf16 %v46_v5, %v46_v5 }
  0x29   :  { %89 = vmatpush1.bf16.msra.mxu0 %v207_v2  ;;  %vm84_vm0 = vcmask 261120   ;;  %v55_v8 = vshrl.u32 %v54_v7, 7  ;;  %v52_v10 = vld [vmem:[%s456_s2] sm:$0x3]  ;;  %s344_s19 = smov [#allocation8]   ;;  %s345_s21 = smov [#allocation10]  }
  0x2a   :  { %90 = vmatprep.subr.bf16.mxu0 %v208_v3  ;;  %s163_s20 = sshll.u32 %s344_s19, 4  ;;  %s173_s22 = sshll.u32 %s345_s21, 4  ;;  %s164_s20 = int_to_ptr.vmem [resolvable:$true] %s163_s20  ;;  %s411_s22 = int_to_ptr.vmem [resolvable:$true] %s173_s22 }
  0x2b   :  { %v56_v9 = vsub.s32 0, %v55_v8  ;;  %v60_v11 = vsub.s32 1, %v55_v8  ;;  %s265_s2 = scalar_lea.vmem %s164_s20, 128  ;;  %p270_p3 = scmp.lt.s32.totalorder %s164_s20, %s164_s20 }
  0x2c   :  { %p266_p2 = scmp.ne.s32.totalorder %s164_s20, %s265_s2  ;;  %p271_p4 = scmp.lt.s32.totalorder %s265_s2, %s265_s2 }
  0x2d   :  { %91 = vmatpush1.bf16.msra.mxu0 %v210_v4  ;;  %v57_v12 = vrot.slane %v52_v10, %v56_v9  ;;  %v61_v13 = vrot.slane %v52_v10, %v60_v11 }
  0x2e   :  { %p272_p5 = por %p271_p4, %p270_p3 }
  0x30   :  { %194 = vmatmul.mubr.msk.bf16.vlgmr.msra.gmra.mrb[0].mxu0 %vm84_vm0, %v47_v6  ;;  %p273_p6 = pnand %p272_p5, %p266_p2 }
 0x103   :  { %v122_v14 = vpop.f32.mrb[0].mxu0 }
 0x104   :  { %v123_v15 = vadd.f32 %v122_v14, %v57_v12  ;;  %v124_v16 = vpop.f32.mrb[1].mxu0 }
 0x105   :  { %v125_v17 = vadd.f32 %v124_v16, %v61_v13  ;;  %v126_v18 = vpop.f32.mrb[2].mxu0 }
 0x106   :  { %145 = vst [vmem:[#allocation8] sm:$0xff] %v123_v15  ;;  %v127_v19 = vpop.f32.mrb[3].mxu0 }
 0x107   :  { %v196_v20 = vmul.f32 -1.442695, %v125_v17  ;;  %146 = vst [vmem:[#allocation10] sm:$0xff] %v125_v17 }
 0x108   :  { %276 = shalt.err (!%p273_p6)
}
 0x109   :  { %s277_s25 = scalar_lea.hbm %s458_s4, 128 }
 0x10a   :  { %p278_p7 = scmp.ne.s32.totalorder %s458_s4, %s277_s25  ;;  %p281_p8 = scmp.lt.u32.totalorder %s277_s25, %s458_s4 }
 0x10c   :  { %p283_p9 = pnand %p281_p8, %p278_p7 }
 0x10e   :  { %286 = shalt.err (!%p283_p9)
}
 0x10f   :  { %166 = dma.vmem_to_hbm [thread:$0]  %s164_s20, 128, %s458_s4, [#allocation9]  }
 0x110   :  { %s287_s7 = scalar_lea.vmem %s411_s22, 128  ;;  %p292_p11 = scmp.lt.s32.totalorder %s411_s22, %s411_s22 }
 0x111   :  { %p288_p10 = scmp.ne.s32.totalorder %s411_s22, %s287_s7  ;;  %p293_p12 = scmp.lt.s32.totalorder %s287_s7, %s287_s7 }
 0x113   :  { %p294_p13 = por %p293_p12, %p292_p11 }
 0x115   :  { %p295_p0 = pnand %p294_p13, %p288_p10 }
 0x117   :  { %298 = shalt.err (!%p295_p0)
}
 0x118   :  { %s299_s10 = scalar_lea.hbm %s459_s5, 128 }
 0x119   :  { %p300_p1 = scmp.ne.s32.totalorder %s459_s5, %s299_s10  ;;  %p303_p2 = scmp.lt.u32.totalorder %s299_s10, %s459_s5 }
 0x11b   :  { %p305_p3 = pnand %p303_p2, %p300_p1 }
 0x11d   :  { %308 = shalt.err (!%p305_p3)
}
 0x11e   :  { %176 = dma.vmem_to_hbm [thread:$0]  %s411_s22, 128, %s459_s5, [#allocation9]   ;;  %211 = vpow2.f32 %v196_v20  ;;  %v195_v21 = vmul.f32 -1.442695, %v123_v15 }
 0x11f   :  { %s346_s15 = smov [#allocation7]  }
 0x120   :  { %213 = vpow2.f32 %v195_v21  ;;  %s153_s16 = sshll.u32 %s346_s15, 4  ;;  %s154_s16 = int_to_ptr.vmem [resolvable:$true] %s153_s16 }
 0x121   :  { %s309_s5 = scalar_lea.vmem %s154_s16, 128  ;;  %p314_p5 = scmp.lt.s32.totalorder %s154_s16, %s154_s16 }
 0x122   :  { %p310_p4 = scmp.ne.s32.totalorder %s154_s16, %s309_s5  ;;  %p315_p6 = scmp.lt.s32.totalorder %s309_s5, %s309_s5 }
 0x124   :  { %p316_p7 = por %p315_p6, %p314_p5 }
 0x126   :  { %p317_p8 = pnand %p316_p7, %p310_p4 }
 0x128   :  { %v212_v22 = vpop.eup %211 }
 0x129   :  { %v138_v23 = vadd.f32 1.0, %v212_v22 }
 0x12a   :  { %v214_v24 = vpop.eup %213 }
 0x12b   :  { %215 = vrcp.f32 %v138_v23  ;;  %v132_v25 = vadd.f32 1.0, %v214_v24 }
 0x12d   :  { %217 = vrcp.f32 %v132_v25 }
 0x135   :  { %v216_v26 = vpop.eup %215 }
 0x136   :  { %v141_v27 = vadd.f32 1e-08, %v216_v26 }
 0x137   :  { %v218_v28 = vpop.eup %217 }
 0x138   :  { %219 = vrcp.f32 %v141_v27 }
 0x142   :  { %v220_v29 = vpop.eup %219 }
 0x143   :  { %v143_v30 = vmul.f32 %v220_v29, %v218_v28 }
 0x145   :  { %144 = vst [vmem:[#allocation7] sm:$0xff] %v143_v30 }
 0x146   :  { %320 = shalt.err (!%p317_p8)
}
 0x147   :  { %s321_s18 = scalar_lea.hbm %s457_s3, 128 }
 0x148   :  { %p322_p9 = scmp.ne.s32.totalorder %s457_s3, %s321_s18  ;;  %p325_p10 = scmp.lt.u32.totalorder %s321_s18, %s457_s3 }
 0x14a   :  { %p327_p11 = pnand %p325_p10, %p322_p9 }
 0x14c   :  { %330 = shalt.err (!%p327_p11)
}
 0x14d   :  { %156 = dma.vmem_to_hbm [thread:$0]  %s154_s16, 128, %s457_s3, [#allocation4]  }
 0x14e   :  { %335 = dma.done.wait [#allocation4], 128  }
 0x14f   :  { %336 = vsyncadd [#allocation4], 4294967168 }
 0x150   :  { %337 = dma.done.wait [#allocation9], 256  }
 0x151   :  { %338 = vsyncadd [#allocation9], 4294967040 }
 0x152   :  { %186 = vsyncpa [#allocation3], 1 }
 0x153   :  { %187 = vsyncpa [#allocation6], 1 }
 0x154   :  { %188 = vsyncpa [#allocation4], 1 }
 0x155   :  { %189 = vsyncpa [#allocation9], 1 }

</bundles_post_ra>
